<compile_context>
chip_gen: v5e
topology: v5e:2x2
jax: 0.10.0
libtpu: 0.0.40
codegen_flags: <defaults>
</compile_context>

<pallas_src>
import jax
import jax.numpy as jnp
from jax import lax
from jax.experimental import pallas as pl
from jax.experimental.pallas import tpu as pltpu


def _discriminator_kernel(x_ref, w_ref, b_ref, o_ref):
    # x_ref: [TB, D]   w_ref: [T, D]   b_ref: [1, T]   o_ref: [TB, T]
    x = x_ref[...]
    w = w_ref[...]
    # Contract x[:, D] with w[:, D] directly on the MXU; f32 accumulate.
    acc = lax.dot_general(
        x, w,
        dimension_numbers=(((1,), (1,)), ((), ())),
        preferred_element_type=jnp.float32,
    )
    # Bias add in f32 on the VPU, then cast to the output dtype.
    o_ref[...] = (acc + b_ref[...].astype(jnp.float32)).astype(o_ref.dtype)


def discriminator_forward(x, weight, bias, *, block_b=512, compute_dtype=None):
    """Equivalent of PyTorch nn.Linear(dim, num_tasks): x @ weight.T + bias.

    x:      [B, dim]
    weight: [num_tasks, dim]   (PyTorch nn.Linear layout)
    bias:   [num_tasks]
    returns [B, num_tasks]

    block_b:       batch-tile size (rows per grid step) for large B.
    compute_dtype: optionally narrow matmul operands (e.g. jnp.bfloat16 on
                   v6e/v7x); accumulation and bias add stay in f32.
    """
    B, D = x.shape
    T, D2 = weight.shape
    assert D == D2 and bias.shape == (T,)

    out_dtype = x.dtype
    if compute_dtype is not None:
        x = x.astype(compute_dtype)
        weight = weight.astype(compute_dtype)

    # Pick a batch tile: multiple of 8 sublanes for f32, 16 for bf16.
    sub = 16 if x.dtype == jnp.bfloat16 else 8
    tb = max(sub, min(int(block_b), pl.cdiv(B, sub) * sub))
    b_pad = pl.cdiv(B, tb) * tb
    if b_pad != B:
        x = jnp.pad(x, ((0, b_pad - B), (0, 0)))

    # Keep bias as a 2-D [1, T] f32 tile so it lives cleanly in VMEM.
    bias2d = bias.reshape(1, T).astype(jnp.float32)

    itemsize = jnp.dtype(x.dtype).itemsize
    cost = pl.CostEstimate(
        flops=2 * b_pad * D * T,
        transcendentals=0,
        bytes_accessed=itemsize * (b_pad * D + T * D)
        + jnp.dtype(out_dtype).itemsize * b_pad * T
        + 4 * T,
    )

    out = pl.pallas_call(
        _discriminator_kernel,
        out_shape=jax.ShapeDtypeStruct((b_pad, T), out_dtype),
        grid_spec=pltpu.PrefetchScalarGridSpec(
            num_scalar_prefetch=0,
            grid=(b_pad // tb,),
            in_specs=[
                # Streamed batch tiles (double-buffered by the pipeline).
                pl.BlockSpec((tb, D), lambda i: (i, 0)),
                # Weight / bias: constant index_map -> DMA'd once, VMEM-resident.
                pl.BlockSpec((T, D), lambda i: (0, 0)),
                pl.BlockSpec((1, T), lambda i: (0, 0)),
            ],
            out_specs=pl.BlockSpec((tb, T), lambda i: (i, 0)),
        ),
        compiler_params=pltpu.CompilerParams(
            # Batch tiles are independent -> shard across TCs on v7x megacore.
            dimension_semantics=("parallel",),
        ),
        cost_estimate=cost,
    )(x, weight, bias2d)

    return out[:B] if b_pad != B else out


if __name__ == "__main__":
    # Small shapes consistent with the module: Discriminator(dim=32, num_tasks=4)
    B, dim, num_tasks = 8, 32, 4

    key = jax.random.PRNGKey(0)
    kx, kw, kb = jax.random.split(key, 3)

    x = jax.random.normal(kx, (B, dim), dtype=jnp.float32)
    # Deterministic synthetic parameters (nn.Linear layout: W [out, in], b [out]).
    weight = jax.random.normal(kw, (num_tasks, dim), dtype=jnp.float32) * 0.1
    bias = jax.random.normal(kb, (num_tasks,), dtype=jnp.float32) * 0.1

    out = discriminator_forward(x, weight, bias)
    out = jax.block_until_ready(out)

    # Pure-JAX reference check.
    ref = x @ weight.T + bias
    assert out.shape == (B, num_tasks)
    assert jnp.allclose(out, ref, atol=1e-5, rtol=1e-5)

    print("KERNEL_OK")
</pallas_src>

<mosaic_0001>
module attributes {stable_mosaic.version = 11 : i64} {
  func.func @_discriminator_kernel(%arg0: i32, %arg1: memref<8x32xf32, #tpu.memory_space<vmem>>, %arg2: memref<4x32xf32, #tpu.memory_space<vmem>>, %arg3: memref<1x4xf32, #tpu.memory_space<vmem>>, %arg4: memref<8x4xf32, #tpu.memory_space<vmem>>) attributes {dimension_semantics = [#tpu.dimension_semantics<parallel>], iteration_bounds = array<i64: 1>, scalar_prefetch = 0 : i64, scratch_operands = 0 : i64, tpu.core_type = #tpu.core_type<tc>, window_params = [{transform_indices = @transform_0, window_bounds = array<i64: 8, 32>}, {pipeline_mode = #tpu.pipeline_mode<synchronous>, transform_indices = @transform_1, window_bounds = array<i64: 4, 32>}, {pipeline_mode = #tpu.pipeline_mode<synchronous>, transform_indices = @transform_2, window_bounds = array<i64: 1, 4>}, {transform_indices = @transform_3, window_bounds = array<i64: 8, 4>}]} {
    %c0 = arith.constant 0 : index
    %c0_0 = arith.constant 0 : index
    %0 = vector.load %arg1[%c0, %c0_0] : memref<8x32xf32, #tpu.memory_space<vmem>>, vector<8x32xf32>
    %c0_1 = arith.constant 0 : index
    %c0_2 = arith.constant 0 : index
    %1 = vector.load %arg2[%c0_1, %c0_2] : memref<4x32xf32, #tpu.memory_space<vmem>>, vector<4x32xf32>
    %cst = arith.constant dense<0.000000e+00> : vector<8x4xf32>
    %2 = tpu.matmul %0, %1, %cst {dimension_numbers = #tpu.dot_dimension_numbers<[1], [1], [0], [0], [0, 0, 1, 0], [], []>} : vector<8x32xf32>, vector<4x32xf32>, vector<8x4xf32> -> vector<8x4xf32>
    %c0_3 = arith.constant 0 : index
    %c0_4 = arith.constant 0 : index
    %3 = vector.load %arg3[%c0_3, %c0_4] : memref<1x4xf32, #tpu.memory_space<vmem>>, vector<1x4xf32>
    %4 = vector.broadcast %3 : vector<1x4xf32> to vector<8x4xf32>
    %5 = arith.addf %2, %4 : vector<8x4xf32>
    %c0_5 = arith.constant 0 : index
    %c0_6 = arith.constant 0 : index
    %6 = vector.load %arg4[%c0_5, %c0_6] : memref<8x4xf32, #tpu.memory_space<vmem>>, vector<8x4xf32>
    tpu.vector_store %arg4[%c0_5, %c0_6], %5 {strides = array<i32>} : memref<8x4xf32, #tpu.memory_space<vmem>>, vector<8x4xf32>,
    return
  }
  func.func @transform_0(%arg0: i32) -> (i32, i32) {
    %c0_i32 = arith.constant 0 : i32
    %c0_i32_0 = arith.constant 0 : i32
    return %arg0, %c0_i32 : i32, i32
  }
  func.func @transform_1(%arg0: i32) -> (i32, i32) {
    %c0_i32 = arith.constant 0 : i32
    %c0_i32_0 = arith.constant 0 : i32
    %c0_i32_1 = arith.constant 0 : i32
    return %c0_i32, %c0_i32_0 : i32, i32
  }
  func.func @transform_2(%arg0: i32) -> (i32, i32) {
    %c0_i32 = arith.constant 0 : i32
    %c0_i32_0 = arith.constant 0 : i32
    %c0_i32_1 = arith.constant 0 : i32
    return %c0_i32, %c0_i32_0 : i32, i32
  }
  func.func @transform_3(%arg0: i32) -> (i32, i32) {
    %c0_i32 = arith.constant 0 : i32
    %c0_i32_0 = arith.constant 0 : i32
    return %arg0, %c0_i32 : i32, i32
  }
}

</mosaic_0001>

<bundles_post_ra>
// kernel: tpu_custom_call.1
= control target key start
LH: loop header
LB: loop body
LE: loop exit
PB: predicated region body
PF: predicated region fallthrough
CT: control target
= control target key end

     0   :  { %8 = vsyncpa [#allocation3], 0  ;;  %s174_s0 = inlined_call_operand.hbm [shape: f32[8,32], index: 0, kind: input, shape index: {}]   ;;  %s175_s1 = inlined_call_operand.hbm [shape: f32[4,32], index: 1, kind: input, shape index: {}]   ;;  %s176_s2 = inlined_call_operand.vmem [shape: f32[1,4], index: 2, kind: input, shape index: {}]   ;;  %s177_s3 = inlined_call_operand.vmem [shape: f32[8,4], index: 3, kind: output, shape index: {}]  }
   0x1   :  { %s15_s14 = sshll.u32 %s174_s0, 4  ;;  %s16_s14 = int_to_ptr.hbm [resolvable:$true] %s15_s14 }
   0x2   :  { %9 = vsyncpa [#allocation5], 0  ;;  %s140_s15 = smov [#allocation2]   ;;  %s26_s19 = sshll.u32 %s175_s1, 4  ;;  %s27_s19 = int_to_ptr.hbm [resolvable:$true] %s26_s19 }
   0x3   :  { %s17_s16 = sshll.u32 %s140_s15, 4  ;;  %s141_s20 = smov [#allocation4]   ;;  %s18_s16 = int_to_ptr.vmem [resolvable:$true] %s17_s16 }
   0x4   :  { %20 = dma.hbm_to_vmem [thread:$0]  %s16_s14, 128, %s18_s16, [#allocation3]  }
   0x5   :  { %s28_s21 = sshll.u32 %s141_s20, 4  ;;  %s29_s21 = int_to_ptr.vmem [resolvable:$true] %s28_s21 }
   0x6   :  { %31 = dma.hbm_to_vmem [thread:$0]  %s27_s19, 64, %s29_s21, [#allocation5]  }
   0x7   :  { %136 = dma.done.wait [#allocation3], 128  }
   0x8   :  { %137 = vsyncadd [#allocation3], 4294967168 }
   0x9   :  { %138 = dma.done.wait [#allocation5], 64  }
   0xa   :  { %139 = vsyncadd [#allocation5], 4294967232  ;;  %vm48_vm0 = vcmask 261120   ;;  %v43_v0 = vld [vmem:[#allocation4] sm:$0xf]  ;;  %v42_v1 = vld [vmem:[#allocation2] sm:$0xff] }
   0xb   :  { %83 = vmatpush.xpose.msk.msra.mxu0 %vm48_vm0, %v43_v0  ;;  %v87_v2 = vld [vmem:[%s176_s2] ss:$0 sm:$0xff]  ;;  %vm75_vm1 = vcmask 31744  }
   0xe   :  { %84 = vmatmul.msk.f32.vlgmr.msra.gmra.mxu0 %vm48_vm0, %v42_v1 }
  0x8b   :  { %v72_v3 = vpop.f32.mrf.mxu0 }
  0x8c   :  { %v73_v4 = vadd.f32 %v87_v2, %v72_v3 }
  0x8e   :  { %76 = vst.msk [vmem:[%s177_s3] sm:$0xff] %vm75_vm1, %v73_v4 }
  0x8f   :  { %81 = vsyncpa [#allocation3], 1 }
  0x90   :  { %82 = vsyncpa [#allocation5], 1 }

</bundles_post_ra>
